<compile_context>
chip_gen: v7x
topology: tpu7x:2x2x1
jax: 0.10.0
libtpu: 0.0.40
codegen_flags: <defaults>
</compile_context>

<pallas_src>
import functools

import jax
import jax.numpy as jnp
from jax import lax
from jax.experimental import pallas as pl
from jax.experimental.pallas import tpu as pltpu


def _round_up(x, m):
    return ((x + m - 1) // m) * m


def _sap_kernel(x_ref, w_ref, o_ref, m_ref, l_ref, acc_ref, *, t_total, t_chunk):
    # x_ref: (bb, Tc, D)   w_ref: (1, D)   o_ref: (bb, D)
    # scratch: m_ref/l_ref (bb, 1) f32, acc_ref (bb, D) f32  (persist over T axis)
    t = pl.program_id(1)

    @pl.when(t == 0)
    def _():
        m_ref[...] = jnp.full_like(m_ref, -jnp.inf)
        l_ref[...] = jnp.zeros_like(l_ref)
        acc_ref[...] = jnp.zeros_like(acc_ref)

    x = x_ref[...].astype(jnp.float32)            # (bb, Tc, D)
    w = w_ref[...].astype(jnp.float32)            # (1, D)

    ragged_t = (t_total % t_chunk) != 0           # static (trace-time) condition
    if ragged_t:
        # Mask the out-of-range tail of the last ragged T chunk: zero x (so any
        # garbage, even Inf/NaN, can't leak via x*e) and push scores to -inf
        # (so the softmax ignores those positions).
        tpos = t * t_chunk + lax.broadcasted_iota(jnp.int32, (1, t_chunk), 1)
        valid = tpos < t_total                    # (1, Tc)
        x = jnp.where(valid[:, :, None], x, 0.0)

    # Score projection on the VPU (broadcast-mul + lane reduce over D).
    # Linear bias dropped: softmax is shift-invariant, so it cannot change attn.
    # TODO(synk): move this to the MXU ((bb*Tc, D) @ (D, 128)) if bundle dumps
    # show the XLU slot binding for very long T on v7x.
    s = jnp.sum(x * w[:, None, :], axis=-1)       # (bb, Tc)
    if ragged_t:
        s = jnp.where(valid, s, -jnp.inf)

    # Online (streaming) softmax over the "arbitrary" T grid axis.
    m_prev = m_ref[...]                            # (bb, 1)
    m_new = jnp.maximum(m_prev, jnp.max(s, axis=-1, keepdims=True))
    alpha = jnp.exp(m_prev - m_new)
    e = jnp.exp(s - m_new)                         # (bb, Tc)
    l_ref[...] = alpha * l_ref[...] + jnp.sum(e, axis=-1, keepdims=True)
    acc_ref[...] = alpha * acc_ref[...] + jnp.sum(x * e[:, :, None], axis=1)
    m_ref[...] = m_new

    @pl.when(t == pl.num_programs(1) - 1)
    def _():
        denom = l_ref[...]
        inv = pl.reciprocal(denom, approx=True)    # EUP
        inv = inv * (2.0 - denom * inv)            # one Newton step -> ~f32 exact
        o_ref[...] = (acc_ref[...] * inv).astype(o_ref.dtype)


def _choose_tiles(B, T, D):
    """Pick (batch block, T chunk). ~6 MiB f32-equivalent per x block: with the
    double-buffered input and block-sized f32 temporaries this stays well under
    v7x's 64 MiB per-TC VMEM, while big enough to amortize the ~0.35 us/step
    grid overhead on v5e/v6e/v7x."""
    max_elems = (6 * 1024 * 1024) // 4

    # T chunk: full T when a minimum batch block still fits, else a multiple of 8
    # (online softmax handles the chunking; ragged tail masked in-kernel).
    if T * D * min(B, 8) <= max_elems:
        tc = T
    else:
        tc = max(8, min(T, ((max_elems // (8 * D)) // 8) * 8))

    # Batch block: equal to B when B < 8, else a multiple of 8 sized to budget.
    if B <= 8:
        bb = B
    else:
        bb = max(8, min(((max_elems // max(tc * D, 1)) // 8) * 8, 1024))
        bb = min(bb, _round_up(B, 8))
        # v7x megacore: aim for >= 4 batch grid steps when B allows, so both
        # TensorCores stay busy and DMAs pipeline within each core.
        if B >= 32:
            bb = min(bb, _round_up(pl.cdiv(B, 4), 8))
        bb = max(8, bb)
    return bb, tc


def self_attention_pooling(x, w, b=None, *, block_b=None, block_t=None):
    """SelfAttentionPooling forward.

    x: (B, T, D) float32 or bfloat16; w: (D,), (D, 1) or (1, D); b ignored
    (the Linear bias is a mathematical no-op under softmax shift-invariance).
    Returns (B, D) in x.dtype.
    """
    del b
    B, T, D = x.shape
    w = jnp.reshape(jnp.asarray(w), (1, D)).astype(x.dtype)

    bb, tc = _choose_tiles(B, T, D)
    if block_b is not None:
        bb = block_b
    if block_t is not None:
        tc = block_t

    n_b = pl.cdiv(B, bb)
    n_t = pl.cdiv(T, tc)

    kernel = functools.partial(_sap_kernel, t_total=T, t_chunk=tc)

    itemsize = jnp.dtype(x.dtype).itemsize
    cost = pl.CostEstimate(
        flops=4 * B * T * D,
        transcendentals=2 * B * T,
        bytes_accessed=B * T * D * itemsize + D * itemsize + B * D * itemsize,
    )

    return pl.pallas_call(
        kernel,
        out_shape=jax.ShapeDtypeStruct((B, D), x.dtype),
        grid_spec=pltpu.PrefetchScalarGridSpec(
            num_scalar_prefetch=0,
            grid=(n_b, n_t),
            in_specs=[
                pl.BlockSpec((bb, tc, D), lambda i, t: (i, t, 0)),
                pl.BlockSpec((1, D), lambda i, t: (0, 0)),
            ],
            out_specs=pl.BlockSpec((bb, D), lambda i, t: (i, 0)),
            scratch_shapes=[
                pltpu.VMEM((bb, 1), jnp.float32),   # running max m
                pltpu.VMEM((bb, 1), jnp.float32),   # running denom l
                pltpu.VMEM((bb, D), jnp.float32),   # un-normalized pooled acc
            ],
        ),
        compiler_params=pltpu.CompilerParams(
            dimension_semantics=("parallel", "arbitrary"),
            vmem_limit_bytes=48 * 1024 * 1024,      # safe on v5e/v6e/v7x
        ),
        cost_estimate=cost,
    )(x, w)


def _reference(x, w, b):
    x = x.astype(jnp.float32)
    w = jnp.reshape(w, (-1, 1)).astype(jnp.float32)
    scores = jnp.einsum("btd,do->bto", x, w)[..., 0] + b.reshape(())   # (B, T)
    attn = jax.nn.softmax(scores, axis=-1)[..., None]                  # (B, T, 1)
    return jnp.sum(x * attn, axis=1)                                   # (B, D)


if __name__ == "__main__":
    key = jax.random.PRNGKey(0)
    kx, kw, kb = jax.random.split(key, 3)

    # Small shapes consistent with the module: batch=2, seq=8, hidden=32.
    B, T, D = 2, 8, 32
    x = jax.random.normal(kx, (B, T, D), dtype=jnp.float32)
    w = jax.random.normal(kw, (D, 1), dtype=jnp.float32) * 0.1   # Linear(D, 1).weight.T
    b = jax.random.normal(kb, (1, 1), dtype=jnp.float32) * 0.1   # Linear(D, 1).bias

    out = jax.block_until_ready(self_attention_pooling(x, w, b))
    ref = _reference(x, w, b)
    assert out.shape == (B, D)
    assert jnp.allclose(out, ref, atol=1e-5, rtol=1e-5), (
        f"f32 mismatch: max abs err {jnp.max(jnp.abs(out - ref))}")

    # Exercise the multi-block path: ragged batch block (B=10, bb=8) and ragged
    # T chunks (T=20, Tc=8) with the online-softmax accumulator.
    B2, T2, D2 = 10, 20, 32
    x2 = jax.random.normal(kx, (B2, T2, D2), dtype=jnp.float32)
    w2 = jax.random.normal(kw, (D2, 1), dtype=jnp.float32) * 0.1
    b2 = jnp.zeros((1, 1), jnp.float32)
    out2 = jax.block_until_ready(
        self_attention_pooling(x2, w2, b2, block_b=8, block_t=8))
    ref2 = _reference(x2, w2, b2)
    assert jnp.allclose(out2, ref2, atol=1e-5, rtol=1e-5), (
        f"multi-block mismatch: max abs err {jnp.max(jnp.abs(out2 - ref2))}")

    # bf16 input path (halves HBM bytes; kernel upcasts to f32 internally).
    x_bf = x.astype(jnp.bfloat16)
    w_bf = w.astype(jnp.bfloat16)
    out_bf = jax.block_until_ready(self_attention_pooling(x_bf, w_bf, b))
    ref_bf = _reference(x_bf.astype(jnp.float32), w_bf.astype(jnp.float32), b)
    assert jnp.allclose(out_bf.astype(jnp.float32), ref_bf, atol=3e-2, rtol=3e-2), (
        f"bf16 mismatch: max abs err "
        f"{jnp.max(jnp.abs(out_bf.astype(jnp.float32) - ref_bf))}")

    print("KERNEL_OK")
</pallas_src>

<mosaic_0001>
module attributes {stable_mosaic.version = 11 : i64} {
  func.func @_sap_kernel(%arg0: i32, %arg1: i32, %arg2: memref<2x8x32xf32, #tpu.memory_space<vmem>>, %arg3: memref<1x32xf32, #tpu.memory_space<vmem>>, %arg4: memref<2x32xf32, #tpu.memory_space<vmem>>, %arg5: memref<2x1xf32, #tpu.memory_space<vmem>>, %arg6: memref<2x1xf32, #tpu.memory_space<vmem>>, %arg7: memref<2x32xf32, #tpu.memory_space<vmem>>) attributes {dimension_semantics = [#tpu.dimension_semantics<parallel>, #tpu.dimension_semantics<arbitrary>], iteration_bounds = array<i64: 1, 1>, scalar_prefetch = 0 : i64, scratch_operands = 3 : i64, tpu.core_type = #tpu.core_type<tc>, window_params = [{transform_indices = @transform_0, window_bounds = array<i64: 2, 8, 32>}, {pipeline_mode = #tpu.pipeline_mode<synchronous>, transform_indices = @transform_1, window_bounds = array<i64: 1, 32>}, {transform_indices = @transform_2, window_bounds = array<i64: 2, 32>}]} {
    %c0_i32 = arith.constant 0 : i32
    %0 = arith.cmpi eq, %arg1, %c0_i32 : i32
    %1 = arith.extui %0 : i1 to i32
    %c0_i32_0 = arith.constant 0 : i32
    %2 = arith.cmpi ne, %1, %c0_i32_0 : i32
    scf.if %2 {
      %cst_22 = arith.constant 0xFF800000 : f32
      %37 = vector.broadcast %cst_22 : f32 to vector<2x1xf32>
      %c0_23 = arith.constant 0 : index
      %c0_24 = arith.constant 0 : index
      %38 = vector.load %arg5[%c0_23, %c0_24] : memref<2x1xf32, #tpu.memory_space<vmem>>, vector<2x1xf32>
      tpu.vector_store %arg5[%c0_23, %c0_24], %37 {strides = array<i32>} : memref<2x1xf32, #tpu.memory_space<vmem>>, vector<2x1xf32>,
      %cst_25 = arith.constant 0.000000e+00 : f32
      %39 = vector.broadcast %cst_25 : f32 to vector<2x1xf32>
      %c0_26 = arith.constant 0 : index
      %c0_27 = arith.constant 0 : index
      %40 = vector.load %arg6[%c0_26, %c0_27] : memref<2x1xf32, #tpu.memory_space<vmem>>, vector<2x1xf32>
      tpu.vector_store %arg6[%c0_26, %c0_27], %39 {strides = array<i32>} : memref<2x1xf32, #tpu.memory_space<vmem>>, vector<2x1xf32>,
      %cst_28 = arith.constant 0.000000e+00 : f32
      %41 = vector.broadcast %cst_28 : f32 to vector<2x32xf32>
      %c0_29 = arith.constant 0 : index
      %c0_30 = arith.constant 0 : index
      %42 = vector.load %arg7[%c0_29, %c0_30] : memref<2x32xf32, #tpu.memory_space<vmem>>, vector<2x32xf32>
      tpu.vector_store %arg7[%c0_29, %c0_30], %41 {strides = array<i32>} : memref<2x32xf32, #tpu.memory_space<vmem>>, vector<2x32xf32>,
    } else {
    }
    %c0 = arith.constant 0 : index
    %c0_1 = arith.constant 0 : index
    %c0_2 = arith.constant 0 : index
    %3 = vector.load %arg2[%c0, %c0_1, %c0_2] : memref<2x8x32xf32, #tpu.memory_space<vmem>>, vector<2x8x32xf32>
    %c0_3 = arith.constant 0 : index
    %c0_4 = arith.constant 0 : index
    %4 = vector.load %arg3[%c0_3, %c0_4] : memref<1x32xf32, #tpu.memory_space<vmem>>, vector<1x32xf32>
    %5 = vector.shape_cast %4 : vector<1x32xf32> to vector<1x1x32xf32>
    %6 = vector.broadcast %5 : vector<1x1x32xf32> to vector<2x8x32xf32>
    %7 = arith.mulf %3, %6 : vector<2x8x32xf32>
    %cst = arith.constant dense<0.000000e+00> : vector<2x8xf32>
    %8 = vector.multi_reduction <add>, %7, %cst [2] : vector<2x8x32xf32> to vector<2x8xf32>
    %c0_5 = arith.constant 0 : index
    %c0_6 = arith.constant 0 : index
    %9 = vector.load %arg5[%c0_5, %c0_6] : memref<2x1xf32, #tpu.memory_space<vmem>>, vector<2x1xf32>
    %cst_7 = arith.constant dense<0xFF800000> : vector<2xf32>
    %10 = vector.multi_reduction <maximumf>, %8, %cst_7 [1] : vector<2x8xf32> to vector<2xf32>
    %11 = vector.shape_cast %10 : vector<2xf32> to vector<2x1xf32>
    %12 = arith.maximumf %9, %11 : vector<2x1xf32>
    %13 = arith.subf %9, %12 : vector<2x1xf32>
    %14 = math.exp %13 : vector<2x1xf32>
    %15 = vector.broadcast %12 : vector<2x1xf32> to vector<2x8xf32>
    %16 = arith.subf %8, %15 : vector<2x8xf32>
    %17 = math.exp %16 : vector<2x8xf32>
    %c0_8 = arith.constant 0 : index
    %c0_9 = arith.constant 0 : index
    %18 = vector.load %arg6[%c0_8, %c0_9] : memref<2x1xf32, #tpu.memory_space<vmem>>, vector<2x1xf32>
    %19 = arith.mulf %14, %18 : vector<2x1xf32>
    %cst_10 = arith.constant dense<0.000000e+00> : vector<2xf32>
    %20 = vector.multi_reduction <add>, %17, %cst_10 [1] : vector<2x8xf32> to vector<2xf32>
    %21 = vector.shape_cast %20 : vector<2xf32> to vector<2x1xf32>
    %22 = arith.addf %19, %21 : vector<2x1xf32>
    %c0_11 = arith.constant 0 : index
    %c0_12 = arith.constant 0 : index
    %23 = vector.load %arg6[%c0_11, %c0_12] : memref<2x1xf32, #tpu.memory_space<vmem>>, vector<2x1xf32>
    tpu.vector_store %arg6[%c0_11, %c0_12], %22 {strides = array<i32>} : memref<2x1xf32, #tpu.memory_space<vmem>>, vector<2x1xf32>,
    %c0_13 = arith.constant 0 : index
    %c0_14 = arith.constant 0 : index
    %24 = vector.load %arg7[%c0_13, %c0_14] : memref<2x32xf32, #tpu.memory_space<vmem>>, vector<2x32xf32>
    %25 = vector.broadcast %14 : vector<2x1xf32> to vector<2x32xf32>
    %26 = arith.mulf %25, %24 : vector<2x32xf32>
    %27 = vector.shape_cast %17 : vector<2x8xf32> to vector<2x8x1xf32>
    %28 = vector.broadcast %27 : vector<2x8x1xf32> to vector<2x8x32xf32>
    %29 = arith.mulf %3, %28 : vector<2x8x32xf32>
    %cst_15 = arith.constant dense<0.000000e+00> : vector<2x32xf32>
    %30 = vector.multi_reduction <add>, %29, %cst_15 [1] : vector<2x8x32xf32> to vector<2x32xf32>
    %31 = arith.addf %26, %30 : vector<2x32xf32>
    %c0_16 = arith.constant 0 : index
    %c0_17 = arith.constant 0 : index
    %32 = vector.load %arg7[%c0_16, %c0_17] : memref<2x32xf32, #tpu.memory_space<vmem>>, vector<2x32xf32>
    tpu.vector_store %arg7[%c0_16, %c0_17], %31 {strides = array<i32>} : memref<2x32xf32, #tpu.memory_space<vmem>>, vector<2x32xf32>,
    %c0_18 = arith.constant 0 : index
    %c0_19 = arith.constant 0 : index
    %33 = vector.load %arg5[%c0_18, %c0_19] : memref<2x1xf32, #tpu.memory_space<vmem>>, vector<2x1xf32>
    tpu.vector_store %arg5[%c0_18, %c0_19], %12 {strides = array<i32>} : memref<2x1xf32, #tpu.memory_space<vmem>>, vector<2x1xf32>,
    %c0_i32_20 = arith.constant 0 : i32
    %34 = arith.cmpi eq, %arg1, %c0_i32_20 : i32
    %35 = arith.extui %34 : i1 to i32
    %c0_i32_21 = arith.constant 0 : i32
    %36 = arith.cmpi ne, %35, %c0_i32_21 : i32
    scf.if %36 {
      %c0_22 = arith.constant 0 : index
      %c0_23 = arith.constant 0 : index
      %37 = vector.load %arg6[%c0_22, %c0_23] : memref<2x1xf32, #tpu.memory_space<vmem>>, vector<2x1xf32>
      %38 = tpu.reciprocal %37 {approx = true} : vector<2x1xf32> -> vector<2x1xf32>
      %39 = arith.mulf %37, %38 : vector<2x1xf32>
      %cst_24 = arith.constant 2.000000e+00 : f32
      %40 = vector.broadcast %cst_24 : f32 to vector<2x1xf32>
      %41 = arith.subf %40, %39 : vector<2x1xf32>
      %42 = arith.mulf %38, %41 : vector<2x1xf32>
      %c0_25 = arith.constant 0 : index
      %c0_26 = arith.constant 0 : index
      %43 = vector.load %arg7[%c0_25, %c0_26] : memref<2x32xf32, #tpu.memory_space<vmem>>, vector<2x32xf32>
      %44 = vector.broadcast %42 : vector<2x1xf32> to vector<2x32xf32>
      %45 = arith.mulf %43, %44 : vector<2x32xf32>
      %c0_27 = arith.constant 0 : index
      %c0_28 = arith.constant 0 : index
      %46 = vector.load %arg4[%c0_27, %c0_28] : memref<2x32xf32, #tpu.memory_space<vmem>>, vector<2x32xf32>
      tpu.vector_store %arg4[%c0_27, %c0_28], %45 {strides = array<i32>} : memref<2x32xf32, #tpu.memory_space<vmem>>, vector<2x32xf32>,
    } else {
    }
    return
  }
  func.func @transform_0(%arg0: i32, %arg1: i32) -> (i32, i32, i32) {
    %c0_i32 = arith.constant 0 : i32
    %c0_i32_0 = arith.constant 0 : i32
    return %arg0, %arg1, %c0_i32 : i32, i32, i32
  }
  func.func @transform_1(%arg0: i32, %arg1: i32) -> (i32, i32) {
    %c0_i32 = arith.constant 0 : i32
    %c0_i32_0 = arith.constant 0 : i32
    %c0_i32_1 = arith.constant 0 : i32
    return %c0_i32, %c0_i32_0 : i32, i32
  }
  func.func @transform_2(%arg0: i32, %arg1: i32) -> (i32, i32) {
    %c0_i32 = arith.constant 0 : i32
    %c0_i32_0 = arith.constant 0 : i32
    return %arg0, %c0_i32 : i32, i32
  }
}

</mosaic_0001>

<bundles_post_ra>
// kernel: tpu_custom_call.1
= control target key start
LH: loop header
LB: loop body
LE: loop exit
PB: predicated region body
PF: predicated region fallthrough
CT: control target
= control target key end

     0   :  { %7 = vsyncpa [#allocation6], 0  ;;  %s318_s0 = inlined_call_operand.hbm [shape: f32[2,8,32], index: 0, kind: input, shape index: {}]   ;;  %s319_s1 = inlined_call_operand.vmem [shape: f32[1,32], index: 1, kind: input, shape index: {}]   ;;  %s320_s2 = inlined_call_operand.hbm [shape: f32[2,32], index: 2, kind: output, shape index: {}]  }
   0x1   :  { %8 = vsyncpa [#allocation7], 0  ;;  %s253_s9 = smov [#allocation5]   ;;  %s205_s13 = scalar_lea.hbm %s318_s0, 256 }
   0x2   :  { %s14_s10 = sshll.u32 %s253_s9, 4  ;;  %p206_p0 = scmp.ne.s32.totalorder %s318_s0, %s205_s13  ;;  %s15_s10 = int_to_ptr.vmem [resolvable:$true] %s14_s10 }
   0x3   :  { %p209_p1 = scmp.lt.u32.totalorder %s205_s13, %s318_s0 }
   0x5   :  { %p211_p2 = pnand %p209_p1, %p206_p0 }
   0x7   :  { %214 = shalt.err (!%p211_p2)
}
   0x8   :  { %s215_s18 = scalar_lea.vmem %s15_s10, 256  ;;  %p220_p4 = scmp.lt.s32.totalorder %s15_s10, %s15_s10 }
   0x9   :  { %p216_p3 = scmp.ne.s32.totalorder %s15_s10, %s215_s18  ;;  %p221_p5 = scmp.lt.s32.totalorder %s215_s18, %s215_s18 }
   0xb   :  { %p222_p6 = por %p221_p5, %p220_p4 }
   0xd   :  { %p223_p7 = pnand %p222_p6, %p216_p3 }
   0xf   :  { %226 = shalt.err (!%p223_p7)
}
  0x10   :  { %s254_s19 = smov 128   ;;  %s255_s20 = smov 8  }
  0x11   :  { %20 = dma.hbm_to_vmem [thread:$0]  %s318_s0, 256, %s15_s10, [#allocation6], %s254_s19, %s254_s19, %s255_s20  }
  0x12   :  { %249 = dma.done.wait [#allocation6], 256  }
  0x13   :  { %250 = vsyncadd [#allocation6], 4294967040  ;;  %v35_v0 = vld [vmem:[#allocation5] sm:$0xff]  ;;  %v187_v1 = vld [vmem:[%s319_s1] ss:$0 sm:$0xff]  ;;  %vm46_vm0 = vcmask 261120   ;;  %v56_v8 = vlaneseq }
  0x14   :  { %v36_v2 = vld [vmem:[#allocation5 + $0x8] sm:$0xff]  ;;  %v44_v3 = vmul.f32 %v187_v1, %v35_v0  ;;  %vm30_vm1 = vcmask 1024   ;;  %v256_v7 = vmov -inf   ;;  %vm66_vm2 = vcmask 1041409   ;;  %s259_s0 = smov [#allocation8]  }
  0x15   :  { %v45_v4 = vmul.f32 %v187_v1, %v36_v2  ;;  %31 = vst.msk [vmem:[#allocation2] sm:$0x3] %vm30_vm1, %v256_v7  ;;  %v57_v9 = vand.u32 127, %v56_v8  ;;  %v59_v10 = vshrl.u32 %v56_v8, 7  ;;  %vm69_vm3 = vcmask 58368   ;;  %s178_s1 = sshll.u32 %s259_s0, 4  ;;  %s179_s1 = int_to_ptr.vmem [resolvable:$true] %s178_s1 }
  0x16   :  { %v47_v5 = vsel %vm46_vm0, %v44_v3, 0.0  ;;  %v257_v18 = vmov 0   ;;  %v258_v19 = vmov 0.0   ;;  %vm33_vm4 = vcmask 254976   ;;  %s227_s25 = scalar_lea.vmem %s179_s1, 32  ;;  %p232_p9 = scmp.lt.s32.totalorder %s179_s1, %s179_s1 }
  0x17   :  { %48 = vadd.xlane.f32.xlu0 %v47_v5  ;;  %v50_v6 = vsel %vm46_vm0, %v45_v4, 0.0  ;;  %v60_v12 = vsub.s32 %v57_v9, %v59_v10  ;;  %195 = vset.pattern.permute.xlu1 %v257_v18  ;;  %32 = vst.msk [vmem:[#allocation3] sm:$0x3] %vm30_vm1, %v258_v19  ;;  %v83_v24 = vsub.s32 0, %v59_v10  ;;  %v87_v25 = vsub.s32 1, %v59_v10  ;;  %p228_p8 = scmp.ne.s32.totalorder %s179_s1, %s227_s25  ;;  %p233_p10 = scmp.lt.s32.totalorder %s227_s25, %s227_s25 }
  0x18   :  { %196 = vset.pattern.permute.xlu0 %v257_v18  ;;  %34 = vst.msk [vmem:[#allocation4] sm:$0x3] %vm33_vm4, %v258_v19 }
  0x19   :  { %p234_p11 = por %p233_p10, %p232_p9 }
  0x1b   :  { %51 = vadd.xlane.f32.xlu0 %v50_v6  ;;  %p235_p12 = pnand %p234_p11, %p228_p8 }
  0x1c   :  { %v53_v20 = vld [vmem:[#allocation2] sm:$0x3] }
  0x1f   :  { %v123_v57 = vld [vmem:[#allocation4] sm:$0x3] }
  0xa4   :  { %v49_v11 = vpop.xlane.xlu0 %48 }
  0xa5   :  { %v61_v14 = vrot.slane %v49_v11, %v60_v12 }
  0xa8   :  { %v52_v13 = vpop.xlane.xlu0 %51 }
  0xa9   :  { %v65_v15 = vrot.slane %v52_v13, %v60_v12 }
  0xab   :  { %v67_v16 = vsel %vm66_vm2, %v65_v15, %v61_v14 }
  0xac   :  { %v70_v17 = vsel %vm69_vm3, %v67_v16, -inf }
  0xad   :  { %71 = vmax.xlane.f32.xlu1 %v70_v17 }
 0x13a   :  { %v72_v21 = vpop.xlane.xlu1 %71 }
 0x13b   :  { %v73_v22 = vmax.f32 %v53_v20, %v72_v21 }
 0x13d   :  { %v74_v23 = vsub.f32 %v53_v20, %v73_v22  ;;  %155 = vst.msk [vmem:[#allocation2] sm:$0x3] %vm30_vm1, %v73_v22  ;;  %79 = vperm.xlu1 %195, %v73_v22  }
 0x13f   :  { %v75_v33 = vmul.f32 1.442695, %v74_v23 }
 0x1bc   :  { %v80_v26 = vpop.permute.xlu1 %79 }
 0x1bd   :  { %v84_v27 = vrot.slane %v80_v26, %v83_v24  ;;  %v88_v28 = vrot.slane %v80_v26, %v87_v25 }
 0x1bf   :  { %v91_v29 = vsub.f32 %v49_v11, %v84_v27  ;;  %v92_v30 = vsub.f32 %v52_v13, %v88_v28 }
 0x1c1   :  { %v93_v31 = vmul.f32 1.442695, %v91_v29  ;;  %v95_v32 = vmul.f32 1.442695, %v92_v30 }
 0x1c3   :  { %197 = vpow2.f32 %v93_v31 }
 0x1c4   :  { %199 = vpow2.f32 %v95_v32 }
 0x1c5   :  { %201 = vpow2.f32 %v75_v33 }
 0x1cd   :  { %v198_v34 = vpop.eup %197 }
 0x1ce   :  { %v200_v35 = vpop.eup %199  ;;  %102 = vperm.xlu0 %196, %v198_v34  }
 0x1cf   :  { %105 = vperm.xlu1 %195, %v200_v35   ;;  %v202_v36 = vpop.eup %201 }
 0x1d2   :  { %126 = vperm.xlu0 %196, %v202_v36  }
 0x24d   :  { %v103_v37 = vpop.permute.xlu0 %102 }
 0x24e   :  { %v106_v38 = vpop.permute.xlu1 %105  ;;  %v110_v39 = vrot.slane %v103_v37, %v60_v12  ;;  %v132_v40 = vmul.f32 %v103_v37, %v35_v0  ;;  %v97_v0 = vld [vmem:[#allocation3] sm:$0x3] }
 0x24f   :  { %v114_v41 = vrot.slane %v106_v38, %v60_v12  ;;  %v133_v42 = vmul.f32 %v106_v38, %v36_v2  ;;  %v98_v1 = vmul.f32 %v202_v36, %v97_v0 }
 0x250   :  { %v134_v43 = vsel %vm46_vm0, %v132_v40, 0.0 }
 0x251   :  { %v141_v44 = vsel %vm46_vm0, %v133_v42, 0.0  ;;  %v135_v45 = vrot.slane %v134_v43, 4  ;;  %v115_v46 = vsel %vm66_vm2, %v114_v41, %v110_v39  ;;  %v127_v58 = vpop.permute.xlu0 %126 }
 0x252   :  { %v142_v47 = vrot.slane %v141_v44, 4  ;;  %v117_v48 = vsel %vm69_vm3, %v115_v46, 0.0  ;;  %v129_v61 = vmul.f32 %v127_v58, %v123_v57 }
 0x253   :  { %v136_v49 = vadd.f32 %v135_v45, %v134_v43  ;;  %118 = vadd.xlane.f32.xlu1 %v117_v48 }
 0x254   :  { %v143_v50 = vadd.f32 %v142_v47, %v141_v44 }
 0x255   :  { %v137_v51 = vrot.slane %v136_v49, 2 }
 0x256   :  { %v144_v52 = vrot.slane %v143_v50, 2 }
 0x257   :  { %v138_v53 = vadd.f32 %v137_v51, %v136_v49 }
 0x258   :  { %v145_v54 = vadd.f32 %v144_v52, %v143_v50 }
 0x259   :  { %v139_v55 = vrot.slane %v138_v53, 1 }
 0x25a   :  { %v146_v56 = vrot.slane %v145_v54, 1 }
 0x25b   :  { %v140_v59 = vadd.f32 %v139_v55, %v138_v53 }
 0x25c   :  { %v147_v60 = vadd.f32 %v146_v56, %v145_v54 }
 0x25e   :  { %v150_v62 = vsel %vm66_vm2, %v147_v60, %v140_v59 }
 0x25f   :  { %v152_v63 = vadd.f32 %v150_v62, %v129_v61 }
 0x261   :  { %154 = vst.msk [vmem:[#allocation4] sm:$0x3] %vm33_vm4, %v152_v63 }
 0x268   :  { %v164_v9 = vld [vmem:[#allocation4] sm:$0x3] }
 0x2e0   :  { %v119_v2 = vpop.xlane.xlu1 %118 }
 0x2e1   :  { %v120_v3 = vadd.f32 %v119_v2, %v98_v1 }
 0x2e3   :  { %122 = vst.msk [vmem:[#allocation3] sm:$0x3] %vm30_vm1, %v120_v3 }
 0x2ea   :  { %v159_v4 = vld [vmem:[#allocation3] sm:$0x3] }
 0x2eb   :  { %203 = vrcp.f32 %v159_v4 }
 0x2f5   :  { %v204_v5 = vpop.eup %203 }
 0x2f6   :  { %v161_v6 = vmul.f32 %v204_v5, %v159_v4 }
 0x2f8   :  { %v162_v7 = vsub.f32 2.0, %v161_v6 }
 0x2fa   :  { %v163_v8 = vmul.f32 %v204_v5, %v162_v7 }
 0x2fc   :  { %167 = vperm.xlu0 %196, %v163_v8  }
 0x37b   :  { %v168_v10 = vpop.permute.xlu0 %167 }
 0x37c   :  { %v170_v11 = vmul.f32 %v168_v10, %v164_v9 }
 0x37e   :  { %171 = vst.msk [vmem:[#allocation8] sm:$0x3] %vm33_vm4, %v170_v11 }
 0x37f   :  { %238 = shalt.err (!%p235_p12)
}
 0x380   :  { %s239_s28 = scalar_lea.hbm %s320_s2, 32 }
 0x381   :  { %p240_p13 = scmp.ne.s32.totalorder %s320_s2, %s239_s28  ;;  %p243_p0 = scmp.lt.u32.totalorder %s239_s28, %s320_s2 }
 0x383   :  { %p245_p1 = pnand %p243_p0, %p240_p13 }
 0x385   :  { %248 = shalt.err (!%p245_p1)
}
 0x386   :  { %181 = dma.vmem_to_hbm [thread:$0]  %s179_s1, 32, %s320_s2, [#allocation7]  }
 0x387   :  { %251 = dma.done.wait [#allocation7], 32  }
 0x388   :  { %252 = vsyncadd [#allocation7], 4294967264 }
 0x389   :  { %185 = vsyncpa [#allocation6], 1 }
 0x38a   :  { %186 = vsyncpa [#allocation7], 1 }

</bundles_post_ra>
